<compile_context>
chip_gen: v6e
topology: v6e:2x2x1
jax: 0.10.0
libtpu: 0.0.40
codegen_flags: <defaults>
</compile_context>

<pallas_src>
import jax
import jax.numpy as jnp
from jax.experimental import pallas as pl
from jax.experimental.pallas import tpu as pltpu


# ---------------------------------------------------------------------------
# Kernels
# ---------------------------------------------------------------------------

def _make_packed_kernel(eb: int, use_scratch: bool):
    """Lane-packed output layout (Out < 128): o/acc view is (bm, eb*Out)."""

    def kernel(x_ref, w_ref, b_ref, o_ref, *scratch):
        # x_ref: (eb, bm, bk) compute dtype   w_ref: (eb, bk, Out) compute dtype
        # b_ref: (1, eb*Out) f32              o_ref: (bm, eb*Out) out dtype
        acc_ref = scratch[0] if use_scratch else o_ref
        k = pl.program_id(2)

        @pl.when(k == 0)
        def _init():
            # Fold the bias add into the accumulator init.
            acc_ref[...] = jnp.broadcast_to(b_ref[...], acc_ref.shape).astype(
                acc_ref.dtype)

        # Unrolled per-member MXU matmuls, concatenated into one lane-dense slab.
        parts = [
            jnp.dot(x_ref[e], w_ref[e], preferred_element_type=jnp.float32)
            for e in range(eb)
        ]
        update = jnp.concatenate(parts, axis=-1) if eb > 1 else parts[0]
        acc_ref[...] = acc_ref[...] + update.astype(acc_ref.dtype)

        if use_scratch:
            @pl.when(k == pl.num_programs(2) - 1)
            def _finalize():
                o_ref[...] = acc_ref[...].astype(o_ref.dtype)

    return kernel


def _make_tiled_kernel(eb: int, use_scratch: bool):
    """General (eb, bm, bn) blocks (lane-dense when bn is a 128-multiple)."""

    def kernel(x_ref, w_ref, b_ref, o_ref, *scratch):
        # x_ref: (eb, bm, bk)   w_ref: (eb, bk, bn)   b_ref: (eb, 1, bn) f32
        # o_ref: (eb, bm, bn)
        acc_ref = scratch[0] if use_scratch else o_ref
        k = pl.program_id(3)

        @pl.when(k == 0)
        def _init():
            acc_ref[...] = jnp.broadcast_to(b_ref[...], acc_ref.shape).astype(
                acc_ref.dtype)

        for e in range(eb):  # unrolled so members interleave on the MXU
            acc_ref[e] = acc_ref[e] + jnp.dot(
                x_ref[e], w_ref[e], preferred_element_type=jnp.float32
            ).astype(acc_ref.dtype)

        if use_scratch:
            @pl.when(k == pl.num_programs(3) - 1)
            def _finalize():
                o_ref[...] = acc_ref[...].astype(o_ref.dtype)

    return kernel


# ---------------------------------------------------------------------------
# Tiling helpers
# ---------------------------------------------------------------------------

def _tpu_vmem_and_cores():
    """Best-effort (VMEM capacity bytes, TensorCores per chip), safe fallback."""
    vmem_cap = 64 * 1024 * 1024   # conservative default: v7x per-TC VMEM
    cores = 1
    try:
        info = pltpu.get_tpu_info()
        vmem_cap = int(getattr(info, "vmem_capacity_bytes", vmem_cap))
        for name in ("num_cores", "num_tensorcores", "tensorcores_per_chip"):
            val = getattr(info, name, None)
            if val:
                cores = int(val)
                break
    except Exception:
        pass
    return vmem_cap, cores


def _pick_tile(dim, cap, aligns):
    """Largest divisor of `dim` that is <= cap and a multiple of one of `aligns`
    (tried in order); `dim` itself if it already fits under the cap."""
    if dim <= cap:
        return dim
    for a in aligns:
        t = (cap // a) * a
        while t >= a:
            if dim % t == 0:
                return t
            t -= a
    # TODO(synk): no aligned divisor <= cap; fall back to the full dimension
    # (non-divisor tiles would need masked partial blocks).
    return dim


def _pick_ensemble_block(E, per_member_bytes, budget, max_eb):
    """Largest divisor of E that is <= max_eb and fits the per-step budget."""
    eb = 1
    for d in range(1, max(1, max_eb) + 1):
        if E % d == 0 and d * per_member_bytes <= budget:
            eb = d
    return eb


# ---------------------------------------------------------------------------
# Wrapper
# ---------------------------------------------------------------------------

def ensemble_fc(x, weight, bias=None, *, compute_dtype=jnp.bfloat16):
    """x: (E, B, In), weight: (E, In, Out), bias: (E, Out) -> (E, B, Out).

    Matches torch.bmm(input, weight) + bias[:, None, :].  Matmul inputs are
    cast to `compute_dtype` (bf16 by default); accumulation and bias stay f32.
    """
    E, B, In = x.shape
    Out = weight.shape[-1]
    assert weight.shape == (E, In, Out)
    out_dtype = x.dtype
    if bias is None:
        bias = jnp.zeros((E, Out), dtype=jnp.float32)

    # Generation-aware VMEM budget and tile caps (v5e/v6e: 128 MiB; v7x: 64 MiB).
    vmem_cap, num_cores = _tpu_vmem_and_cores()
    if vmem_cap >= 128 * 1024 * 1024:
        vmem_limit = 96 * 1024 * 1024
        block_budget = 32 * 1024 * 1024
        bm_cap, bn_cap, bk_cap = 512, 512, 1024
    else:
        vmem_limit = 48 * 1024 * 1024
        block_budget = 12 * 1024 * 1024
        bm_cap, bn_cap, bk_cap = 256, 256, 512

    c_itemsize = jnp.dtype(compute_dtype).itemsize
    o_itemsize = jnp.dtype(out_dtype).itemsize
    sublane = max(8, 32 // c_itemsize)           # 8 (f32) / 16 (bf16) / 32 (int8)

    bm = _pick_tile(B, bm_cap, (sublane, 8))     # sublane dim
    bk = _pick_tile(In, bk_cap, (256, 128))      # contraction (lane) dim
    packed = Out < 128                           # lane-pack eb members when Out is narrow
    bn = Out if packed else _pick_tile(Out, bn_cap, (256, 128))

    n_tiles, b_tiles, k_tiles = Out // bn, B // bm, In // bk
    use_scratch = jnp.dtype(out_dtype) != jnp.float32

    per_member = (
        2 * (bm * bk + bk * bn) * c_itemsize     # double-buffered x / W blocks
        + 2 * bn * 4                             # bias block (f32)
        + 2 * bm * bn * o_itemsize               # output block
        + (bm * bn * 4 if use_scratch else 0)    # f32 accumulator scratch
    )

    # v5e/v6e (1 TC): let eb grow to E.  v7x (2 TCs): keep >= num_cores grid
    # steps only when the rest of the parallel grid is a single tile.
    if num_cores > 1 and n_tiles * b_tiles < num_cores and E >= num_cores:
        max_eb = max(1, E // num_cores)
    else:
        max_eb = E
    eb = _pick_ensemble_block(E, per_member, block_budget, max_eb)

    x_c = x.astype(compute_dtype)
    w_c = weight.astype(compute_dtype)
    bias_f32 = bias.astype(jnp.float32)

    def _call_packed():
        g = E // eb
        bias_pk = bias_f32.reshape(g, 1, eb * Out)   # members packed along lanes
        out_pk = pl.pallas_call(
            _make_packed_kernel(eb, use_scratch),
            out_shape=jax.ShapeDtypeStruct((g, B, eb * Out), out_dtype),
            grid_spec=pltpu.PrefetchScalarGridSpec(
                num_scalar_prefetch=0,
                grid=(g, b_tiles, k_tiles),
                in_specs=[
                    pl.BlockSpec((eb, bm, bk), lambda gi, b, k: (gi, b, k)),
                    pl.BlockSpec((eb, bk, Out), lambda gi, b, k: (gi, k, 0)),
                    pl.BlockSpec((pl.Squeezed(), 1, eb * Out),
                                 lambda gi, b, k: (gi, 0, 0)),
                ],
                out_specs=pl.BlockSpec((pl.Squeezed(), bm, eb * Out),
                                       lambda gi, b, k: (gi, b, 0)),
                scratch_shapes=(
                    [pltpu.VMEM((bm, eb * Out), jnp.float32)] if use_scratch else []
                ),
            ),
            compiler_params=pltpu.CompilerParams(
                dimension_semantics=("parallel", "parallel", "arbitrary"),
                vmem_limit_bytes=vmem_limit,
            ),
        )(x_c, w_c, bias_pk)
        # Un-pack: (E//eb, B, eb*Out) -> (E, B, Out).
        return (out_pk.reshape(g, B, eb, Out)
                .transpose(0, 2, 1, 3)
                .reshape(E, B, Out))

    def _call_tiled():
        bias3 = bias_f32.reshape(E, 1, Out)
        return pl.pallas_call(
            _make_tiled_kernel(eb, use_scratch),
            out_shape=jax.ShapeDtypeStruct((E, B, Out), out_dtype),
            grid_spec=pltpu.PrefetchScalarGridSpec(
                num_scalar_prefetch=0,
                grid=(E // eb, n_tiles, b_tiles, k_tiles),
                in_specs=[
                    # activations: independent of the Out-tile axis
                    pl.BlockSpec((eb, bm, bk), lambda gi, n, b, k: (gi, b, k)),
                    # weights: independent of the B-tile axis
                    pl.BlockSpec((eb, bk, bn), lambda gi, n, b, k: (gi, k, n)),
                    # bias: invariant over B and K
                    pl.BlockSpec((eb, 1, bn), lambda gi, n, b, k: (gi, 0, n)),
                ],
                out_specs=pl.BlockSpec((eb, bm, bn),
                                       lambda gi, n, b, k: (gi, b, n)),
                scratch_shapes=(
                    [pltpu.VMEM((eb, bm, bn), jnp.float32)] if use_scratch else []
                ),
            ),
            compiler_params=pltpu.CompilerParams(
                dimension_semantics=("parallel", "parallel", "parallel", "arbitrary"),
                vmem_limit_bytes=vmem_limit,
            ),
        )(x_c, w_c, bias3)

    if packed:
        try:
            return _call_packed()
        except Exception:
            # TODO(synk): lane-packed concat failed to lower on this backend;
            # fall back to the (correct, narrower-store) tiled layout.
            pass
    return _call_tiled()


def ensemble_fc_ref(x, weight, bias):
    # Pure-JAX reference of torch.bmm + bias broadcast (full f32 precision).
    return jnp.einsum("ebi,eio->ebo", x, weight,
                      precision=jax.lax.Precision.HIGHEST) + bias[:, None, :]


if __name__ == "__main__":
    # Small shapes consistent with the module: ensemble=4, batch=8, in=32, out=32.
    E, B, In, Out = 4, 8, 32, 32

    key = jax.random.PRNGKey(0)
    kx, kw, kb = jax.random.split(key, 3)
    x = jax.random.normal(kx, (E, B, In), dtype=jnp.float32)
    weight = jax.random.normal(kw, (E, In, Out), dtype=jnp.float32) * 0.05
    bias = jax.random.normal(kb, (E, Out), dtype=jnp.float32) * 0.1

    out = ensemble_fc(x, weight, bias)          # bf16 MXU inputs, f32 accumulation
    out = jax.block_until_ready(out)

    ref = ensemble_fc_ref(x, weight, bias)
    assert out.shape == (E, B, Out) and out.dtype == x.dtype
    # bf16 matmul inputs (f32 accumulation) -> loosened tolerance vs the f32 reference.
    err = float(jnp.max(jnp.abs(out - ref)))
    assert jnp.allclose(out, ref, atol=2e-2, rtol=2e-2), err

    print("KERNEL_OK")
</pallas_src>

<mosaic_0001>
module attributes {stable_mosaic.version = 11 : i64} {
  func.func @kernel(%arg0: i32, %arg1: i32, %arg2: i32, %arg3: memref<4x8x32xbf16, #tpu.memory_space<vmem>>, %arg4: memref<4x32x32xbf16, #tpu.memory_space<vmem>>, %arg5: memref<1x1x128xf32, #tpu.memory_space<vmem>>, %arg6: memref<1x8x128xf32, #tpu.memory_space<vmem>>) attributes {dimension_semantics = [#tpu.dimension_semantics<parallel>, #tpu.dimension_semantics<parallel>, #tpu.dimension_semantics<arbitrary>], iteration_bounds = array<i64: 1, 1, 1>, scalar_prefetch = 0 : i64, scratch_operands = 0 : i64, tpu.core_type = #tpu.core_type<tc>, window_params = [{transform_indices = @transform_0, window_bounds = array<i64: 4, 8, 32>}, {transform_indices = @transform_1, window_bounds = array<i64: 4, 32, 32>}, {transform_indices = @transform_2, window_bounds = array<i64: 1, 1, 128>}, {transform_indices = @transform_3, window_bounds = array<i64: 1, 8, 128>}]} {
    %c0_i32 = arith.constant 0 : i32
    %0 = arith.cmpi eq, %arg2, %c0_i32 : i32
    %1 = arith.extui %0 : i1 to i32
    %c0_i32_0 = arith.constant 0 : i32
    %2 = arith.cmpi ne, %1, %c0_i32_0 : i32
    scf.if %2 {
      %c0_30 = arith.constant 0 : index
      %c0_31 = arith.constant 0 : index
      %c0_32 = arith.constant 0 : index
      %30 = vector.load %arg5[%c0_30, %c0_31, %c0_32] : memref<1x1x128xf32, #tpu.memory_space<vmem>>, vector<1x1x128xf32>
      %31 = vector.shape_cast %30 : vector<1x1x128xf32> to vector<1x128xf32>
      %32 = vector.shape_cast %31 : vector<1x128xf32> to vector<1x128xf32>
      %33 = vector.broadcast %32 : vector<1x128xf32> to vector<8x128xf32>
      %c0_33 = arith.constant 0 : index
      %c0_34 = arith.constant 0 : index
      %c0_35 = arith.constant 0 : index
      %34 = vector.load %arg6[%c0_33, %c0_34, %c0_35] : memref<1x8x128xf32, #tpu.memory_space<vmem>>, vector<1x8x128xf32>
      %35 = vector.shape_cast %34 : vector<1x8x128xf32> to vector<8x128xf32>
      %36 = vector.shape_cast %33 : vector<8x128xf32> to vector<1x8x128xf32>
      tpu.vector_store %arg6[%c0_33, %c0_34, %c0_35], %36 {strides = array<i32>} : memref<1x8x128xf32, #tpu.memory_space<vmem>>, vector<1x8x128xf32>,
    } else {
    }
    %c0 = arith.constant 0 : index
    %c0_1 = arith.constant 0 : index
    %c0_2 = arith.constant 0 : index
    %3 = vector.load %arg3[%c0, %c0_1, %c0_2] : memref<4x8x32xbf16, #tpu.memory_space<vmem>>, vector<1x8x32xbf16>
    %4 = vector.shape_cast %3 : vector<1x8x32xbf16> to vector<8x32xbf16>
    %c0_3 = arith.constant 0 : index
    %c0_4 = arith.constant 0 : index
    %c0_5 = arith.constant 0 : index
    %5 = vector.load %arg4[%c0_3, %c0_4, %c0_5] : memref<4x32x32xbf16, #tpu.memory_space<vmem>>, vector<1x32x32xbf16>
    %6 = vector.shape_cast %5 : vector<1x32x32xbf16> to vector<32x32xbf16>
    %cst = arith.constant dense<0.000000e+00> : vector<8x32xf32>
    %7 = tpu.matmul %4, %6, %cst {dimension_numbers = #tpu.dot_dimension_numbers<[1], [0], [0], [1], [0, 0, 1, 1], [], []>} : vector<8x32xbf16>, vector<32x32xbf16>, vector<8x32xf32> -> vector<8x32xf32>
    %c1 = arith.constant 1 : index
    %c0_6 = arith.constant 0 : index
    %c0_7 = arith.constant 0 : index
    %8 = vector.load %arg3[%c1, %c0_6, %c0_7] : memref<4x8x32xbf16, #tpu.memory_space<vmem>>, vector<1x8x32xbf16>
    %9 = vector.shape_cast %8 : vector<1x8x32xbf16> to vector<8x32xbf16>
    %c1_8 = arith.constant 1 : index
    %c0_9 = arith.constant 0 : index
    %c0_10 = arith.constant 0 : index
    %10 = vector.load %arg4[%c1_8, %c0_9, %c0_10] : memref<4x32x32xbf16, #tpu.memory_space<vmem>>, vector<1x32x32xbf16>
    %11 = vector.shape_cast %10 : vector<1x32x32xbf16> to vector<32x32xbf16>
    %cst_11 = arith.constant dense<0.000000e+00> : vector<8x32xf32>
    %12 = tpu.matmul %9, %11, %cst_11 {dimension_numbers = #tpu.dot_dimension_numbers<[1], [0], [0], [1], [0, 0, 1, 1], [], []>} : vector<8x32xbf16>, vector<32x32xbf16>, vector<8x32xf32> -> vector<8x32xf32>
    %c2 = arith.constant 2 : index
    %c0_12 = arith.constant 0 : index
    %c0_13 = arith.constant 0 : index
    %13 = vector.load %arg3[%c2, %c0_12, %c0_13] : memref<4x8x32xbf16, #tpu.memory_space<vmem>>, vector<1x8x32xbf16>
    %14 = vector.shape_cast %13 : vector<1x8x32xbf16> to vector<8x32xbf16>
    %c2_14 = arith.constant 2 : index
    %c0_15 = arith.constant 0 : index
    %c0_16 = arith.constant 0 : index
    %15 = vector.load %arg4[%c2_14, %c0_15, %c0_16] : memref<4x32x32xbf16, #tpu.memory_space<vmem>>, vector<1x32x32xbf16>
    %16 = vector.shape_cast %15 : vector<1x32x32xbf16> to vector<32x32xbf16>
    %cst_17 = arith.constant dense<0.000000e+00> : vector<8x32xf32>
    %17 = tpu.matmul %14, %16, %cst_17 {dimension_numbers = #tpu.dot_dimension_numbers<[1], [0], [0], [1], [0, 0, 1, 1], [], []>} : vector<8x32xbf16>, vector<32x32xbf16>, vector<8x32xf32> -> vector<8x32xf32>
    %c3 = arith.constant 3 : index
    %c0_18 = arith.constant 0 : index
    %c0_19 = arith.constant 0 : index
    %18 = vector.load %arg3[%c3, %c0_18, %c0_19] : memref<4x8x32xbf16, #tpu.memory_space<vmem>>, vector<1x8x32xbf16>
    %19 = vector.shape_cast %18 : vector<1x8x32xbf16> to vector<8x32xbf16>
    %c3_20 = arith.constant 3 : index
    %c0_21 = arith.constant 0 : index
    %c0_22 = arith.constant 0 : index
    %20 = vector.load %arg4[%c3_20, %c0_21, %c0_22] : memref<4x32x32xbf16, #tpu.memory_space<vmem>>, vector<1x32x32xbf16>
    %21 = vector.shape_cast %20 : vector<1x32x32xbf16> to vector<32x32xbf16>
    %cst_23 = arith.constant dense<0.000000e+00> : vector<8x32xf32>
    %22 = tpu.matmul %19, %21, %cst_23 {dimension_numbers = #tpu.dot_dimension_numbers<[1], [0], [0], [1], [0, 0, 1, 1], [], []>} : vector<8x32xbf16>, vector<32x32xbf16>, vector<8x32xf32> -> vector<8x32xf32>
    %23 = tpu.concatenate %7, %12, %17, %22 in 1 : vector<8x32xf32>, vector<8x32xf32>, vector<8x32xf32>, vector<8x32xf32> -> vector<8x128xf32>
    %c0_24 = arith.constant 0 : index
    %c0_25 = arith.constant 0 : index
    %c0_26 = arith.constant 0 : index
    %24 = vector.load %arg6[%c0_24, %c0_25, %c0_26] : memref<1x8x128xf32, #tpu.memory_space<vmem>>, vector<1x8x128xf32>
    %25 = vector.shape_cast %24 : vector<1x8x128xf32> to vector<8x128xf32>
    %26 = arith.addf %25, %23 : vector<8x128xf32>
    %c0_27 = arith.constant 0 : index
    %c0_28 = arith.constant 0 : index
    %c0_29 = arith.constant 0 : index
    %27 = vector.load %arg6[%c0_27, %c0_28, %c0_29] : memref<1x8x128xf32, #tpu.memory_space<vmem>>, vector<1x8x128xf32>
    %28 = vector.shape_cast %27 : vector<1x8x128xf32> to vector<8x128xf32>
    %29 = vector.shape_cast %26 : vector<8x128xf32> to vector<1x8x128xf32>
    tpu.vector_store %arg6[%c0_27, %c0_28, %c0_29], %29 {strides = array<i32>} : memref<1x8x128xf32, #tpu.memory_space<vmem>>, vector<1x8x128xf32>,
    return
  }
  func.func @transform_0(%arg0: i32, %arg1: i32, %arg2: i32) -> (i32, i32, i32) {
    %c0_i32 = arith.constant 0 : i32
    return %arg0, %arg1, %arg2 : i32, i32, i32
  }
  func.func @transform_1(%arg0: i32, %arg1: i32, %arg2: i32) -> (i32, i32, i32) {
    %c0_i32 = arith.constant 0 : i32
    %c0_i32_0 = arith.constant 0 : i32
    return %arg0, %arg2, %c0_i32 : i32, i32, i32
  }
  func.func @transform_2(%arg0: i32, %arg1: i32, %arg2: i32) -> (i32, i32, i32) {
    %c0_i32 = arith.constant 0 : i32
    %c0_i32_0 = arith.constant 0 : i32
    %c0_i32_1 = arith.constant 0 : i32
    return %arg0, %c0_i32, %c0_i32_0 : i32, i32, i32
  }
  func.func @transform_3(%arg0: i32, %arg1: i32, %arg2: i32) -> (i32, i32, i32) {
    %c0_i32 = arith.constant 0 : i32
    %c0_i32_0 = arith.constant 0 : i32
    return %arg0, %arg1, %c0_i32 : i32, i32, i32
  }
}

module attributes {stable_mosaic.version = 11 : i64} {
  func.func @kernel(%arg0: i32, %arg1: i32, %arg2: i32, %arg3: i32, %arg4: memref<4x8x32xbf16, #tpu.memory_space<vmem>>, %arg5: memref<4x32x32xbf16, #tpu.memory_space<vmem>>, %arg6: memref<4x1x32xf32, #tpu.memory_space<vmem>>, %arg7: memref<4x8x32xf32, #tpu.memory_space<vmem>>) attributes {dimension_semantics = [#tpu.dimension_semantics<parallel>, #tpu.dimension_semantics<parallel>, #tpu.dimension_semantics<parallel>, #tpu.dimension_semantics<arbitrary>], iteration_bounds = array<i64: 1, 1, 1, 1>, scalar_prefetch = 0 : i64, scratch_operands = 0 : i64, tpu.core_type = #tpu.core_type<tc>, window_params = [{transform_indices = @transform_0, window_bounds = array<i64: 4, 8, 32>}, {transform_indices = @transform_1, window_bounds = array<i64: 4, 32, 32>}, {transform_indices = @transform_2, window_bounds = array<i64: 4, 1, 32>}, {transform_indices = @transform_3, window_bounds = array<i64: 4, 8, 32>}]} {
    %c0_i32 = arith.constant 0 : i32
    %0 = arith.cmpi eq, %arg3, %c0_i32 : i32
    %1 = arith.extui %0 : i1 to i32
    %c0_i32_0 = arith.constant 0 : i32
    %2 = arith.cmpi ne, %1, %c0_i32_0 : i32
    scf.if %2 {
      %c0_48 = arith.constant 0 : index
      %c0_49 = arith.constant 0 : index
      %c0_50 = arith.constant 0 : index
      %47 = vector.load %arg6[%c0_48, %c0_49, %c0_50] : memref<4x1x32xf32, #tpu.memory_space<vmem>>, vector<4x1x32xf32>
      %48 = vector.shape_cast %47 : vector<4x1x32xf32> to vector<4x1x32xf32>
      %49 = vector.broadcast %48 : vector<4x1x32xf32> to vector<4x8x32xf32>
      %c0_51 = arith.constant 0 : index
      %c0_52 = arith.constant 0 : index
      %c0_53 = arith.constant 0 : index
      %50 = vector.load %arg7[%c0_51, %c0_52, %c0_53] : memref<4x8x32xf32, #tpu.memory_space<vmem>>, vector<4x8x32xf32>
      tpu.vector_store %arg7[%c0_51, %c0_52, %c0_53], %49 {strides = array<i32>} : memref<4x8x32xf32, #tpu.memory_space<vmem>>, vector<4x8x32xf32>,
    } else {
    }
    %c0 = arith.constant 0 : index
    %c0_1 = arith.constant 0 : index
    %c0_2 = arith.constant 0 : index
    %3 = vector.load %arg7[%c0, %c0_1, %c0_2] : memref<4x8x32xf32, #tpu.memory_space<vmem>>, vector<1x8x32xf32>
    %4 = vector.shape_cast %3 : vector<1x8x32xf32> to vector<8x32xf32>
    %c0_3 = arith.constant 0 : index
    %c0_4 = arith.constant 0 : index
    %c0_5 = arith.constant 0 : index
    %5 = vector.load %arg4[%c0_3, %c0_4, %c0_5] : memref<4x8x32xbf16, #tpu.memory_space<vmem>>, vector<1x8x32xbf16>
    %6 = vector.shape_cast %5 : vector<1x8x32xbf16> to vector<8x32xbf16>
    %c0_6 = arith.constant 0 : index
    %c0_7 = arith.constant 0 : index
    %c0_8 = arith.constant 0 : index
    %7 = vector.load %arg5[%c0_6, %c0_7, %c0_8] : memref<4x32x32xbf16, #tpu.memory_space<vmem>>, vector<1x32x32xbf16>
    %8 = vector.shape_cast %7 : vector<1x32x32xbf16> to vector<32x32xbf16>
    %cst = arith.constant dense<0.000000e+00> : vector<8x32xf32>
    %9 = tpu.matmul %6, %8, %cst {dimension_numbers = #tpu.dot_dimension_numbers<[1], [0], [0], [1], [0, 0, 1, 1], [], []>} : vector<8x32xbf16>, vector<32x32xbf16>, vector<8x32xf32> -> vector<8x32xf32>
    %10 = arith.addf %4, %9 : vector<8x32xf32>
    %c0_9 = arith.constant 0 : index
    %c0_10 = arith.constant 0 : index
    %c0_11 = arith.constant 0 : index
    %11 = vector.load %arg7[%c0_9, %c0_10, %c0_11] : memref<4x8x32xf32, #tpu.memory_space<vmem>>, vector<1x8x32xf32>
    %12 = vector.shape_cast %11 : vector<1x8x32xf32> to vector<8x32xf32>
    %13 = vector.shape_cast %10 : vector<8x32xf32> to vector<1x8x32xf32>
    tpu.vector_store %arg7[%c0_9, %c0_10, %c0_11], %13 {strides = array<i32>} : memref<4x8x32xf32, #tpu.memory_space<vmem>>, vector<1x8x32xf32>,
    %c1 = arith.constant 1 : index
    %c0_12 = arith.constant 0 : index
    %c0_13 = arith.constant 0 : index
    %14 = vector.load %arg7[%c1, %c0_12, %c0_13] : memref<4x8x32xf32, #tpu.memory_space<vmem>>, vector<1x8x32xf32>
    %15 = vector.shape_cast %14 : vector<1x8x32xf32> to vector<8x32xf32>
    %c1_14 = arith.constant 1 : index
    %c0_15 = arith.constant 0 : index
    %c0_16 = arith.constant 0 : index
    %16 = vector.load %arg4[%c1_14, %c0_15, %c0_16] : memref<4x8x32xbf16, #tpu.memory_space<vmem>>, vector<1x8x32xbf16>
    %17 = vector.shape_cast %16 : vector<1x8x32xbf16> to vector<8x32xbf16>
    %c1_17 = arith.constant 1 : index
    %c0_18 = arith.constant 0 : index
    %c0_19 = arith.constant 0 : index
    %18 = vector.load %arg5[%c1_17, %c0_18, %c0_19] : memref<4x32x32xbf16, #tpu.memory_space<vmem>>, vector<1x32x32xbf16>
    %19 = vector.shape_cast %18 : vector<1x32x32xbf16> to vector<32x32xbf16>
    %cst_20 = arith.constant dense<0.000000e+00> : vector<8x32xf32>
    %20 = tpu.matmul %17, %19, %cst_20 {dimension_numbers = #tpu.dot_dimension_numbers<[1], [0], [0], [1], [0, 0, 1, 1], [], []>} : vector<8x32xbf16>, vector<32x32xbf16>, vector<8x32xf32> -> vector<8x32xf32>
    %21 = arith.addf %15, %20 : vector<8x32xf32>
    %c1_21 = arith.constant 1 : index
    %c0_22 = arith.constant 0 : index
    %c0_23 = arith.constant 0 : index
    %22 = vector.load %arg7[%c1_21, %c0_22, %c0_23] : memref<4x8x32xf32, #tpu.memory_space<vmem>>, vector<1x8x32xf32>
    %23 = vector.shape_cast %22 : vector<1x8x32xf32> to vector<8x32xf32>
    %24 = vector.shape_cast %21 : vector<8x32xf32> to vector<1x8x32xf32>
    tpu.vector_store %arg7[%c1_21, %c0_22, %c0_23], %24 {strides = array<i32>} : memref<4x8x32xf32, #tpu.memory_space<vmem>>, vector<1x8x32xf32>,
    %c2 = arith.constant 2 : index
    %c0_24 = arith.constant 0 : index
    %c0_25 = arith.constant 0 : index
    %25 = vector.load %arg7[%c2, %c0_24, %c0_25] : memref<4x8x32xf32, #tpu.memory_space<vmem>>, vector<1x8x32xf32>
    %26 = vector.shape_cast %25 : vector<1x8x32xf32> to vector<8x32xf32>
    %c2_26 = arith.constant 2 : index
    %c0_27 = arith.constant 0 : index
    %c0_28 = arith.constant 0 : index
    %27 = vector.load %arg4[%c2_26, %c0_27, %c0_28] : memref<4x8x32xbf16, #tpu.memory_space<vmem>>, vector<1x8x32xbf16>
    %28 = vector.shape_cast %27 : vector<1x8x32xbf16> to vector<8x32xbf16>
    %c2_29 = arith.constant 2 : index
    %c0_30 = arith.constant 0 : index
    %c0_31 = arith.constant 0 : index
    %29 = vector.load %arg5[%c2_29, %c0_30, %c0_31] : memref<4x32x32xbf16, #tpu.memory_space<vmem>>, vector<1x32x32xbf16>
    %30 = vector.shape_cast %29 : vector<1x32x32xbf16> to vector<32x32xbf16>
    %cst_32 = arith.constant dense<0.000000e+00> : vector<8x32xf32>
    %31 = tpu.matmul %28, %30, %cst_32 {dimension_numbers = #tpu.dot_dimension_numbers<[1], [0], [0], [1], [0, 0, 1, 1], [], []>} : vector<8x32xbf16>, vector<32x32xbf16>, vector<8x32xf32> -> vector<8x32xf32>
    %32 = arith.addf %26, %31 : vector<8x32xf32>
    %c2_33 = arith.constant 2 : index
    %c0_34 = arith.constant 0 : index
    %c0_35 = arith.constant 0 : index
    %33 = vector.load %arg7[%c2_33, %c0_34, %c0_35] : memref<4x8x32xf32, #tpu.memory_space<vmem>>, vector<1x8x32xf32>
    %34 = vector.shape_cast %33 : vector<1x8x32xf32> to vector<8x32xf32>
    %35 = vector.shape_cast %32 : vector<8x32xf32> to vector<1x8x32xf32>
    tpu.vector_store %arg7[%c2_33, %c0_34, %c0_35], %35 {strides = array<i32>} : memref<4x8x32xf32, #tpu.memory_space<vmem>>, vector<1x8x32xf32>,
    %c3 = arith.constant 3 : index
    %c0_36 = arith.constant 0 : index
    %c0_37 = arith.constant 0 : index
    %36 = vector.load %arg7[%c3, %c0_36, %c0_37] : memref<4x8x32xf32, #tpu.memory_space<vmem>>, vector<1x8x32xf32>
    %37 = vector.shape_cast %36 : vector<1x8x32xf32> to vector<8x32xf32>
    %c3_38 = arith.constant 3 : index
    %c0_39 = arith.constant 0 : index
    %c0_40 = arith.constant 0 : index
    %38 = vector.load %arg4[%c3_38, %c0_39, %c0_40] : memref<4x8x32xbf16, #tpu.memory_space<vmem>>, vector<1x8x32xbf16>
    %39 = vector.shape_cast %38 : vector<1x8x32xbf16> to vector<8x32xbf16>
    %c3_41 = arith.constant 3 : index
    %c0_42 = arith.constant 0 : index
    %c0_43 = arith.constant 0 : index
    %40 = vector.load %arg5[%c3_41, %c0_42, %c0_43] : memref<4x32x32xbf16, #tpu.memory_space<vmem>>, vector<1x32x32xbf16>
    %41 = vector.shape_cast %40 : vector<1x32x32xbf16> to vector<32x32xbf16>
    %cst_44 = arith.constant dense<0.000000e+00> : vector<8x32xf32>
    %42 = tpu.matmul %39, %41, %cst_44 {dimension_numbers = #tpu.dot_dimension_numbers<[1], [0], [0], [1], [0, 0, 1, 1], [], []>} : vector<8x32xbf16>, vector<32x32xbf16>, vector<8x32xf32> -> vector<8x32xf32>
    %43 = arith.addf %37, %42 : vector<8x32xf32>
    %c3_45 = arith.constant 3 : index
    %c0_46 = arith.constant 0 : index
    %c0_47 = arith.constant 0 : index
    %44 = vector.load %arg7[%c3_45, %c0_46, %c0_47] : memref<4x8x32xf32, #tpu.memory_space<vmem>>, vector<1x8x32xf32>
    %45 = vector.shape_cast %44 : vector<1x8x32xf32> to vector<8x32xf32>
    %46 = vector.shape_cast %43 : vector<8x32xf32> to vector<1x8x32xf32>
    tpu.vector_store %arg7[%c3_45, %c0_46, %c0_47], %46 {strides = array<i32>} : memref<4x8x32xf32, #tpu.memory_space<vmem>>, vector<1x8x32xf32>,
    return
  }
  func.func @transform_0(%arg0: i32, %arg1: i32, %arg2: i32, %arg3: i32) -> (i32, i32, i32) {
    %c0_i32 = arith.constant 0 : i32
    return %arg0, %arg2, %arg3 : i32, i32, i32
  }
  func.func @transform_1(%arg0: i32, %arg1: i32, %arg2: i32, %arg3: i32) -> (i32, i32, i32) {
    %c0_i32 = arith.constant 0 : i32
    return %arg0, %arg3, %arg1 : i32, i32, i32
  }
  func.func @transform_2(%arg0: i32, %arg1: i32, %arg2: i32, %arg3: i32) -> (i32, i32, i32) {
    %c0_i32 = arith.constant 0 : i32
    %c0_i32_0 = arith.constant 0 : i32
    return %arg0, %c0_i32, %arg1 : i32, i32, i32
  }
  func.func @transform_3(%arg0: i32, %arg1: i32, %arg2: i32, %arg3: i32) -> (i32, i32, i32) {
    %c0_i32 = arith.constant 0 : i32
    return %arg0, %arg2, %arg1 : i32, i32, i32
  }
}

</mosaic_0001>

<bundles_post_ra>
// kernel: tpu_custom_call.1
= control target key start
LH: loop header
LB: loop body
LE: loop exit
PB: predicated region body
PF: predicated region fallthrough
CT: control target
= control target key end

     0   :  { %8 = vsyncpa [#allocation3], 0  ;;  %s534_s0 = inlined_call_operand.hbm [shape: bf16[4,8,32], index: 0, kind: input, shape index: {}]   ;;  %s535_s1 = inlined_call_operand.hbm [shape: bf16[4,32,32], index: 1, kind: input, shape index: {}]   ;;  %s536_s2 = inlined_call_operand.vmem [shape: f32[1,1,128], index: 2, kind: input, shape index: {}]   ;;  %s537_s3 = inlined_call_operand.hbm [shape: f32[1,8,128], index: 3, kind: output, shape index: {}]  }
   0x1   :  { %9 = vsyncpa [#allocation6], 0 }
   0x2   :  { %10 = vsyncpa [#allocation4], 0  ;;  %s479_s12 = smov [#allocation2]  }
   0x3   :  { %s16_s13 = sshll.u32 %s479_s12, 4  ;;  %s17_s13 = int_to_ptr.vmem [resolvable:$true] %s16_s13 }
   0x4   :  { %s421_s14 = scalar_lea.vmem %s17_s13, 256  ;;  %p426_p1 = scmp.lt.s32.totalorder %s17_s13, %s17_s13 }
   0x5   :  { %p422_p0 = scmp.ne.s32.totalorder %s17_s13, %s421_s14  ;;  %p427_p2 = scmp.lt.s32.totalorder %s421_s14, %s421_s14 }
   0x7   :  { %p428_p3 = por %p427_p2, %p426_p1 }
   0x9   :  { %p429_p4 = pnand %p428_p3, %p422_p0 }
   0xb   :  { %432 = shalt.err (!%p429_p4)
}
   0xc   :  { %s480_s15 = smov 64   ;;  %s481_s16 = smov 4  }
   0xd   :  { %22 = dma.hbm_to_vmem [thread:$0]  %s534_s0, 256, %s17_s13, [#allocation3], %s480_s15, %s480_s15, %s481_s16  }
   0xe   :  { %s482_s19 = smov [#allocation5]  }
   0xf   :  { %s28_s20 = sshll.u32 %s482_s19, 4  ;;  %s29_s20 = int_to_ptr.vmem [resolvable:$true] %s28_s20 }
  0x10   :  { %s441_s21 = scalar_lea.vmem %s29_s20, 1024  ;;  %p446_p6 = scmp.lt.s32.totalorder %s29_s20, %s29_s20 }
  0x11   :  { %p442_p5 = scmp.ne.s32.totalorder %s29_s20, %s441_s21  ;;  %p447_p7 = scmp.lt.s32.totalorder %s441_s21, %s441_s21 }
  0x13   :  { %p448_p8 = por %p447_p7, %p446_p6 }
  0x15   :  { %p449_p9 = pnand %p448_p8, %p442_p5 }
  0x17   :  { %452 = shalt.err (!%p449_p9)
}
  0x18   :  { %34 = dma.hbm_to_vmem [thread:$0]  %s535_s1, 1024, %s29_s20, [#allocation6], %s480_s15, %s480_s15, %s481_s16  }
  0x19   :  { %473 = dma.done.wait [#allocation3], 256  }
  0x1a   :  { %474 = vsyncadd [#allocation3], 4294967040 }
  0x1b   :  { %475 = dma.done.wait [#allocation6], 1024  }
  0x1c   :  { %476 = vsyncadd [#allocation6], 4294966272  ;;  %v483_v0 = vmov 0.0   ;;  %vm484_vm0 = vmmov 0   ;;  %v405_v1 = vld [vmem:[#allocation5 + $0x8] sm:$0xff]   ;;  %v406_v2 = vld [vmem:[#allocation5 + $0x18] sm:$0xff]  }
  0x1d   :  { %364 = vmatprep.subr.bf16.mxu0 %v483_v0  ;;  %372 = vmatprep.subr.bf16.mxu1 %v483_v0  ;;  %v407_v3 = vld [vmem:[#allocation5] sm:$0xff]   ;;  %v408_v4 = vld [vmem:[#allocation5 + $0x10] sm:$0xff]   ;;  %vm73_vm1 = vcmask 261120   ;;  %v409_v7 = vld [vmem:[#allocation5 + $0x28] sm:$0xff]   ;;  %s485_s0 = smov 32   ;;  %s486_s1 = smov 96  }
  0x1e   :  { %368 = vmatprep.mubr.msk.bf16.mxu0 %vm484_vm0, %v483_v0  ;;  %376 = vmatprep.mubr.msk.bf16.mxu1 %vm484_vm0, %v483_v0  ;;  %v56_v5 = vld [vmem:[#allocation2] sm:$0xf]  ;;  %v118_v6 = vld [vmem:[#allocation2 + $0x4] sm:$0xf]  ;;  %v410_v8 = vld [vmem:[#allocation5 + $0x38] sm:$0xff]   ;;  %vm316_vm2 = vcmask 523264  }
  0x1f   :  { %365 = vmatpush3.bf16.msra.mxu0 %v405_v1  ;;  %373 = vmatpush3.bf16.msra.mxu1 %v406_v2  ;;  %v411_v9 = vld [vmem:[#allocation5 + $0x20] sm:$0xff]   ;;  %v412_v10 = vld [vmem:[#allocation5 + $0x30] sm:$0xff]   ;;  %v180_v11 = vld [vmem:[#allocation2 + $0x8] sm:$0xf]  ;;  %vm318_vm3 = vcmask 785408   ;;  %s487_s26 = smov [#allocation7]  }
  0x20   :  { %366 = vmatprep.subr.bf16.mxu0 %v483_v0  ;;  %374 = vmatprep.subr.bf16.mxu1 %v483_v0  ;;  %v242_v12 = vld [vmem:[#allocation2 + $0xc] sm:$0xf]  ;;  %v339_v32 = vld [vmem:[%s536_s2] ss:$0 sm:$0xff]  ;;  %s329_s27 = sshll.u32 %s487_s26, 4  ;;  %s330_s27 = int_to_ptr.vmem [resolvable:$true] %s329_s27 }
  0x21   :  { %s453_s28 = scalar_lea.vmem %s330_s27, 128  ;;  %p458_p11 = scmp.lt.s32.totalorder %s330_s27, %s330_s27 }
  0x22   :  { %p454_p10 = scmp.ne.s32.totalorder %s330_s27, %s453_s28  ;;  %p459_p12 = scmp.lt.s32.totalorder %s453_s28, %s453_s28 }
  0x23   :  { %367 = vmatpush3.bf16.msra.mxu0 %v407_v3  ;;  %375 = vmatpush3.bf16.msra.mxu1 %v408_v4 }
  0x24   :  { %380 = vmatprep.subr.bf16.mxu0 %v483_v0  ;;  %388 = vmatprep.subr.bf16.mxu1 %v483_v0  ;;  %p460_p13 = por %p459_p12, %p458_p11 }
  0x26   :  { %369 = vmatmul.mubr.msk.bf16.vlgmr.msra.gmra.mxu0 %vm73_vm1, %v56_v5  ;;  %377 = vmatmul.mubr.msk.bf16.vlgmr.msra.gmra.mxu1 %vm73_vm1, %v118_v6  ;;  %p461_p0 = pnand %p460_p13, %p454_p10 }
  0x27   :  { %381 = vmatpush3.bf16.msra.mxu0 %v409_v7  ;;  %389 = vmatpush3.bf16.msra.mxu1 %v410_v8 }
  0x28   :  { %382 = vmatprep.subr.bf16.mxu0 %v483_v0  ;;  %390 = vmatprep.subr.bf16.mxu1 %v483_v0 }
  0x29   :  { %384 = vmatprep.mubr.msk.bf16.mxu0 %vm484_vm0, %v483_v0  ;;  %392 = vmatprep.mubr.msk.bf16.mxu1 %vm484_vm0, %v483_v0 }
  0x2b   :  { %383 = vmatpush3.bf16.msra.mxu0 %v411_v9  ;;  %391 = vmatpush3.bf16.msra.mxu1 %v412_v10 }
  0x2e   :  { %385 = vmatmul.mubr.msk.bf16.vlgmr.msra.gmra.mxu0 %vm73_vm1, %v180_v11  ;;  %393 = vmatmul.mubr.msk.bf16.vlgmr.msra.gmra.mxu1 %vm73_vm1, %v242_v12 }
  0xe6   :  { %v111_v13 = vpop.f32.mrf.mxu0  ;;  %v173_v14 = vpop.f32.mrf.mxu1 }
  0xe7   :  { %304 = vrot.lane.b32.xlu0 %v173_v14, %s485_s0 }
  0xe8   :  { %v370_v15 = vpop.f32.mrf.mxu0  ;;  %v378_v16 = vpop.f32.mrf.mxu1 }
  0xea   :  { %v114_v17 = vpop.f32.mrf.mxu0  ;;  %v176_v18 = vpop.f32.mrf.mxu1 }
  0xec   :  { %v371_v19 = vpop.f32.mrf.mxu0  ;;  %v379_v20 = vpop.f32.mrf.mxu1 }
  0xee   :  { %v235_v21 = vpop.f32.mrf.mxu0  ;;  %v297_v22 = vpop.f32.mrf.mxu1 }
  0xef   :  { %308 = vrot.lane.b32.xlu0 %v235_v21, %s480_s15  ;;  %312 = vrot.lane.b32.xlu1 %v297_v22, %s486_s1 }
  0xf0   :  { %v386_v23 = vpop.f32.mrf.mxu0  ;;  %v394_v24 = vpop.f32.mrf.mxu1 }
  0xf2   :  { %v238_v25 = vpop.f32.mrf.mxu0  ;;  %v300_v26 = vpop.f32.mrf.mxu1 }
  0xf4   :  { %v387_v27 = vpop.f32.mrf.mxu0  ;;  %v395_v28 = vpop.f32.mrf.mxu1 }
 0x159   :  { %v305_v29 = vpop.permute.xlu0 %304 }
 0x15a   :  { %v315_v30 = vsel %vm73_vm1, %v111_v13, %v305_v29 }
 0x161   :  { %v309_v31 = vpop.permute.xlu0 %308  ;;  %v313_v34 = vpop.permute.xlu1 %312 }
 0x162   :  { %v317_v33 = vsel %vm316_vm2, %v315_v30, %v309_v31 }
 0x163   :  { %v319_v35 = vsel %vm318_vm3, %v317_v33, %v313_v34 }
 0x164   :  { %v321_v36 = vadd.f32 %v339_v32, %v319_v35 }
 0x166   :  { %322 = vst [vmem:[#allocation7] sm:$0xff] %v321_v36 }
 0x167   :  { %464 = shalt.err (!%p461_p0)
}
 0x168   :  { %332 = dma.vmem_to_hbm [thread:$0]  %s330_s27, 128, %s537_s3, [#allocation4]  }
 0x169   :  { %477 = dma.done.wait [#allocation4], 128  }
 0x16a   :  { %478 = vsyncadd [#allocation4], 4294967168 }
 0x16b   :  { %336 = vsyncpa [#allocation3], 1 }
 0x16c   :  { %337 = vsyncpa [#allocation6], 1 }
 0x16d   :  { %338 = vsyncpa [#allocation4], 1 }

// kernel: tpu_custom_call.1
= control target key start
LH: loop header
LB: loop body
LE: loop exit
PB: predicated region body
PF: predicated region fallthrough
CT: control target
= control target key end

     0   :  { %8 = vsyncpa [#allocation3], 0  ;;  %s600_s0 = inlined_call_operand.hbm [shape: bf16[4,8,32], index: 0, kind: input, shape index: {}]   ;;  %s601_s1 = inlined_call_operand.hbm [shape: bf16[4,32,32], index: 1, kind: input, shape index: {}]   ;;  %s602_s2 = inlined_call_operand.hbm [shape: f32[4,1,32], index: 2, kind: input, shape index: {}]   ;;  %s603_s3 = inlined_call_operand.hbm [shape: f32[4,8,32], index: 3, kind: output, shape index: {}]  }
   0x1   :  { %9 = vsyncpa [#allocation6], 0 }
   0x2   :  { %10 = vsyncpa [#allocation4], 0  ;;  %s540_s12 = smov [#allocation5]   ;;  %s541_s14 = smov [#allocation2]  }
   0x3   :  { %s28_s13 = sshll.u32 %s540_s12, 4  ;;  %s16_s15 = sshll.u32 %s541_s14, 4  ;;  %s29_s13 = int_to_ptr.vmem [resolvable:$true] %s28_s13  ;;  %s17_s15 = int_to_ptr.vmem [resolvable:$true] %s16_s15 }
   0x4   :  { %s462_s16 = scalar_lea.vmem %s29_s13, 1024  ;;  %p467_p1 = scmp.lt.s32.totalorder %s29_s13, %s29_s13 }
   0x5   :  { %p463_p0 = scmp.ne.s32.totalorder %s29_s13, %s462_s16  ;;  %p468_p2 = scmp.lt.s32.totalorder %s462_s16, %s462_s16 }
   0x7   :  { %p469_p3 = por %p468_p2, %p467_p1 }
   0x9   :  { %p470_p4 = pnand %p469_p3, %p463_p0 }
   0xb   :  { %473 = shalt.err (!%p470_p4)
}
   0xc   :  { %s542_s17 = smov 64   ;;  %s543_s18 = smov 4  }
   0xd   :  { %34 = dma.hbm_to_vmem [thread:$0]  %s601_s1, 1024, %s29_s13, [#allocation6], %s542_s17, %s542_s17, %s543_s18  }
   0xe   :  { %s482_s21 = scalar_lea.vmem %s17_s15, 256  ;;  %p487_p6 = scmp.lt.s32.totalorder %s17_s15, %s17_s15 }
   0xf   :  { %p483_p5 = scmp.ne.s32.totalorder %s17_s15, %s482_s21  ;;  %p488_p7 = scmp.lt.s32.totalorder %s482_s21, %s482_s21 }
  0x11   :  { %p489_p8 = por %p488_p7, %p487_p6 }
  0x13   :  { %p490_p9 = pnand %p489_p8, %p483_p5 }
  0x15   :  { %493 = shalt.err (!%p490_p9)
}
  0x16   :  { %22 = dma.hbm_to_vmem [thread:$0]  %s600_s0, 256, %s17_s15, [#allocation3], %s542_s17, %s542_s17, %s543_s18  }
  0x17   :  { %s544_s24 = smov [#allocation7]  }
  0x18   :  { %s40_s25 = sshll.u32 %s544_s24, 4  ;;  %s41_s25 = int_to_ptr.vmem [resolvable:$true] %s40_s25 }
  0x19   :  { %s502_s26 = scalar_lea.vmem %s41_s25, 64  ;;  %p507_p11 = scmp.lt.s32.totalorder %s41_s25, %s41_s25 }
  0x1a   :  { %p503_p10 = scmp.ne.s32.totalorder %s41_s25, %s502_s26  ;;  %p508_p12 = scmp.lt.s32.totalorder %s502_s26, %s502_s26 }
  0x1c   :  { %p509_p13 = por %p508_p12, %p507_p11 }
  0x1e   :  { %p510_p0 = pnand %p509_p13, %p503_p10 }
  0x20   :  { %513 = shalt.err (!%p510_p0)
}
  0x21   :  { %s545_s1 = smov 16   ;;  %s546_s27 = smov 1  }
  0x22   :  { %46 = dma.hbm_to_vmem [thread:$0]  %s602_s2, 64, %s41_s25, [#allocation6], %s545_s1, %s545_s1, %s546_s27  }
  0x23   :  { %534 = dma.done.wait [#allocation3], 256  }
  0x24   :  { %535 = vsyncadd [#allocation3], 4294967040 }
  0x25   :  { %536 = dma.done.wait [#allocation6], 1088  }
  0x26   :  { %537 = vsyncadd [#allocation6], 4294966208  ;;  %v547_v0 = vmov 0.0   ;;  %vm548_vm0 = vmmov 0   ;;  %v446_v1 = vld [vmem:[#allocation5 + $0x8] sm:$0xff]   ;;  %v447_v2 = vld [vmem:[#allocation5 + $0x18] sm:$0xff]  }
  0x27   :  { %402 = vmatprep.subr.bf16.mxu0 %v547_v0  ;;  %410 = vmatprep.subr.bf16.mxu1 %v547_v0  ;;  %v448_v3 = vld [vmem:[#allocation5] sm:$0xff]   ;;  %v449_v4 = vld [vmem:[#allocation5 + $0x10] sm:$0xff]   ;;  %vm89_vm1 = vcmask 261120   ;;  %v450_v7 = vld [vmem:[#allocation5 + $0x28] sm:$0xff]   ;;  %s549_s0 = smov [#allocation8]  }
  0x28   :  { %406 = vmatprep.mubr.msk.bf16.mxu0 %vm548_vm0, %v547_v0  ;;  %414 = vmatprep.mubr.msk.bf16.mxu1 %vm548_vm0, %v547_v0  ;;  %v95_v5 = vld [vmem:[#allocation2] sm:$0xf]  ;;  %v161_v6 = vld [vmem:[#allocation2 + $0x4] sm:$0xf]  ;;  %v451_v8 = vld [vmem:[#allocation5 + $0x38] sm:$0xff]   ;;  %s361_s2 = sshll.u32 %s549_s0, 4  ;;  %s362_s2 = int_to_ptr.vmem [resolvable:$true] %s361_s2 }
  0x29   :  { %403 = vmatpush3.bf16.msra.mxu0 %v446_v1  ;;  %411 = vmatpush3.bf16.msra.mxu1 %v447_v2  ;;  %v374_v9 = vld [vmem:[#allocation7] ss:$0 sm:$0xff]  ;;  %v453_v11 = vld [vmem:[#allocation5 + $0x30] sm:$0xff]   ;;  %v227_v12 = vld [vmem:[#allocation2 + $0x8] sm:$0xf]  ;;  %s514_s30 = scalar_lea.vmem %s362_s2, 512  ;;  %p519_p2 = scmp.lt.s32.totalorder %s362_s2, %s362_s2 }
  0x2a   :  { %404 = vmatprep.subr.bf16.mxu0 %v547_v0  ;;  %412 = vmatprep.subr.bf16.mxu1 %v547_v0  ;;  %v452_v10 = vld [vmem:[#allocation5 + $0x20] sm:$0xff]   ;;  %90 = vst.msk [vmem:[#allocation8] sm:$0xff] %vm89_vm1, %v374_v9  ;;  %v293_v13 = vld [vmem:[#allocation2 + $0xc] sm:$0xf]  ;;  %p515_p1 = scmp.ne.s32.totalorder %s362_s2, %s514_s30  ;;  %p520_p3 = scmp.lt.s32.totalorder %s514_s30, %s514_s30 }
  0x2b   :  { %v375_v14 = vld [vmem:[#allocation7 + $0x1] ss:$0 sm:$0xff]  ;;  %v376_v15 = vld [vmem:[#allocation7 + $0x2] ss:$0 sm:$0xff]  ;;  %v377_v16 = vld [vmem:[#allocation7 + $0x3] ss:$0 sm:$0xff] }
  0x2c   :  { %91 = vst.msk [vmem:[#allocation8 + $0x8] sm:$0xff] %vm89_vm1, %v375_v14  ;;  %92 = vst.msk [vmem:[#allocation8 + $0x10] sm:$0xff] %vm89_vm1, %v376_v15  ;;  %p521_p4 = por %p520_p3, %p519_p2 }
  0x2d   :  { %405 = vmatpush3.bf16.msra.mxu0 %v448_v3  ;;  %413 = vmatpush3.bf16.msra.mxu1 %v449_v4  ;;  %93 = vst.msk [vmem:[#allocation8 + $0x18] sm:$0xff] %vm89_vm1, %v377_v16 }
  0x2e   :  { %418 = vmatprep.subr.bf16.mxu0 %v547_v0  ;;  %426 = vmatprep.subr.bf16.mxu1 %v547_v0  ;;  %p522_p5 = pnand %p521_p4, %p515_p1 }
  0x30   :  { %407 = vmatmul.mubr.msk.bf16.vlgmr.msra.gmra.mxu0 %vm89_vm1, %v95_v5  ;;  %415 = vmatmul.mubr.msk.bf16.vlgmr.msra.gmra.mxu1 %vm89_vm1, %v161_v6 }
  0x31   :  { %419 = vmatpush3.bf16.msra.mxu0 %v450_v7  ;;  %427 = vmatpush3.bf16.msra.mxu1 %v451_v8  ;;  %v94_v17 = vld [vmem:[#allocation8] sm:$0xff] }
  0x32   :  { %420 = vmatprep.subr.bf16.mxu0 %v547_v0  ;;  %428 = vmatprep.subr.bf16.mxu1 %v547_v0 }
  0x33   :  { %422 = vmatprep.mubr.msk.bf16.mxu0 %vm548_vm0, %v547_v0  ;;  %430 = vmatprep.mubr.msk.bf16.mxu1 %vm548_vm0, %v547_v0  ;;  %v159_v18 = vld [vmem:[#allocation8 + $0x8] sm:$0xff]  ;;  %v225_v28 = vld [vmem:[#allocation8 + $0x10] sm:$0xff] }
  0x34   :  { %v291_v30 = vld [vmem:[#allocation8 + $0x18] sm:$0xff] }
  0x35   :  { %421 = vmatpush3.bf16.msra.mxu0 %v452_v10  ;;  %429 = vmatpush3.bf16.msra.mxu1 %v453_v11 }
  0x38   :  { %423 = vmatmul.mubr.msk.bf16.vlgmr.msra.gmra.mxu0 %vm89_vm1, %v227_v12  ;;  %431 = vmatmul.mubr.msk.bf16.vlgmr.msra.gmra.mxu1 %vm89_vm1, %v293_v13 }
  0xf0   :  { %v150_v19 = vpop.f32.mrf.mxu0  ;;  %v216_v21 = vpop.f32.mrf.mxu1 }
  0xf1   :  { %v156_v20 = vadd.f32 %v150_v19, %v94_v17  ;;  %v222_v22 = vadd.f32 %v216_v21, %v159_v18 }
  0xf2   :  { %v408_v23 = vpop.f32.mrf.mxu0  ;;  %v416_v24 = vpop.f32.mrf.mxu1 }
  0xf3   :  { %157 = vst.msk [vmem:[#allocation8] sm:$0xff] %vm89_vm1, %v156_v20  ;;  %223 = vst.msk [vmem:[#allocation8 + $0x8] sm:$0xff] %vm89_vm1, %v222_v22 }
  0xf4   :  { %v153_v25 = vpop.f32.mrf.mxu0  ;;  %v219_v26 = vpop.f32.mrf.mxu1 }
  0xf6   :  { %v409_v27 = vpop.f32.mrf.mxu0  ;;  %v417_v29 = vpop.f32.mrf.mxu1 }
  0xf8   :  { %v282_v31 = vpop.f32.mrf.mxu0  ;;  %v348_v33 = vpop.f32.mrf.mxu1 }
  0xf9   :  { %v288_v32 = vadd.f32 %v282_v31, %v225_v28  ;;  %v354_v34 = vadd.f32 %v348_v33, %v291_v30 }
  0xfa   :  { %v424_v35 = vpop.f32.mrf.mxu0  ;;  %v432_v36 = vpop.f32.mrf.mxu1 }
  0xfb   :  { %289 = vst.msk [vmem:[#allocation8 + $0x10] sm:$0xff] %vm89_vm1, %v288_v32  ;;  %355 = vst.msk [vmem:[#allocation8 + $0x18] sm:$0xff] %vm89_vm1, %v354_v34 }
  0xfc   :  { %v285_v37 = vpop.f32.mrf.mxu0  ;;  %v351_v38 = vpop.f32.mrf.mxu1 }
  0xfd   :  { %525 = shalt.err (!%p522_p5)
}
  0xfe   :  { %s550_s4 = smov 128   ;;  %s551_s5 = smov 8   ;;  %v425_v39 = vpop.f32.mrf.mxu0  ;;  %v433_v40 = vpop.f32.mrf.mxu1 }
  0xff   :  { %367 = dma.vmem_to_hbm [thread:$0]  %s362_s2, 512, %s603_s3, [#allocation4], %s550_s4, %s550_s4, %s551_s5  }
 0x100   :  { %538 = dma.done.wait [#allocation4], 512  }
 0x101   :  { %539 = vsyncadd [#allocation4], 4294966784 }
 0x102   :  { %371 = vsyncpa [#allocation3], 1 }
 0x103   :  { %372 = vsyncpa [#allocation6], 1 }
 0x104   :  { %373 = vsyncpa [#allocation4], 1 }

</bundles_post_ra>
